<compile_context>
chip_gen: v5e
topology: v5e:2x2
jax: 0.10.0
libtpu: 0.0.40
codegen_flags: <defaults>
</compile_context>

<pallas_src>
import functools
import math

import jax
import jax.numpy as jnp
import numpy as np
from jax.experimental import pallas as pl
from jax.experimental.pallas import tpu as pltpu


def _round_up(x, m):
    return (x + m - 1) // m * m


def _pick_tile(M, tile_m):
    """Pick (row_tile, padded_rows).  Prefers choices that need no pad copy."""
    M16 = _round_up(M, 16)            # sublane-pack friendly for bf16
    if M16 <= tile_m:
        return M16, M16
    for tm in (tile_m, tile_m // 2, tile_m // 4):
        if tm >= 128 and M % tm == 0:
            return tm, M
    return tile_m, _round_up(M, tile_m)


def _im2col_nhwc(x, Kh, Kw, stride, padding, Ho, Wo):
    """(N,H,W,Cin) -> (N*Ho*Wo, Kh*Kw*Cin), feature order (ky, kx, cin)."""
    N, H, W, Cin = x.shape
    if padding:
        x = jnp.pad(x, ((0, 0), (padding, padding), (padding, padding), (0, 0)))
    if Kh == 1 and Kw == 1 and stride == 1:
        return x.reshape(N * Ho * Wo, Cin)
    cols = []
    for ky in range(Kh):
        for kx in range(Kw):
            cols.append(jax.lax.slice(
                x, (0, ky, kx, 0),
                (N, ky + (Ho - 1) * stride + 1, kx + (Wo - 1) * stride + 1, Cin),
                (1, stride, stride, 1)))
    return jnp.concatenate(cols, axis=-1).reshape(N * Ho * Wo, Kh * Kw * Cin)


# ---------------------------------------------------------------------------
# Fused conv-as-matmul kernel:  o = relu?(A @ W + b)
# ---------------------------------------------------------------------------
def _conv_mm_kernel(a_ref, w_ref, b_ref, o_ref, *, relu_out):
    acc = jnp.dot(a_ref[...], w_ref[...], preferred_element_type=jnp.float32)
    acc = acc + b_ref[...].astype(jnp.float32)
    if relu_out:
        acc = jnp.maximum(acc, 0.0)
    o_ref[...] = acc.astype(o_ref.dtype)


def conv2d_nhwc(x, w, b, *, stride=1, padding=0, relu_out=False, tile_m=512):
    """Conv2d (PyTorch semantics) on NHWC input, fused bias / output-ReLU.

    x: (N, H, W, Cin)   w: (Cout, Cin, Kh, Kw)   b: (Cout,)
    Returns (N, Ho, Wo, Cout) in x.dtype.
    """
    N, H, W, Cin = x.shape
    Cout, _, Kh, Kw = w.shape
    Ho = (H + 2 * padding - Kh) // stride + 1
    Wo = (W + 2 * padding - Kw) // stride + 1
    M = N * Ho * Wo
    Kd = Kh * Kw * Cin

    a = _im2col_nhwc(x, Kh, Kw, stride, padding, Ho, Wo)          # (M, Kd)
    w_mat = jnp.transpose(w, (2, 3, 1, 0)).reshape(Kd, Cout).astype(x.dtype)
    b_row = b.reshape(1, Cout).astype(jnp.float32)

    tm, M_pad = _pick_tile(M, tile_m)
    if M_pad != M:
        a = jnp.pad(a, ((0, M_pad - M), (0, 0)))

    isz = jnp.dtype(x.dtype).itemsize
    cost = pl.CostEstimate(
        flops=2 * M_pad * Kd * Cout,
        transcendentals=0,
        bytes_accessed=(M_pad * Kd * isz + Kd * Cout * isz
                        + Cout * 4 + M_pad * Cout * isz))

    out = pl.pallas_call(
        functools.partial(_conv_mm_kernel, relu_out=relu_out),
        out_shape=jax.ShapeDtypeStruct((M_pad, Cout), x.dtype),
        grid_spec=pltpu.PrefetchScalarGridSpec(
            num_scalar_prefetch=0,
            grid=(M_pad // tm,),
            in_specs=[
                pl.BlockSpec((tm, Kd), lambda i: (i, 0)),      # patch tile
                pl.BlockSpec((Kd, Cout), lambda i: (0, 0)),    # weights (resident)
                pl.BlockSpec((1, Cout), lambda i: (0, 0)),     # bias (resident)
            ],
            out_specs=pl.BlockSpec((tm, Cout), lambda i: (i, 0)),
        ),
        compiler_params=pltpu.CompilerParams(
            dimension_semantics=("parallel",)),
        cost_estimate=cost,
    )(a, w_mat, b_row)

    return out[:M].reshape(N, Ho, Wo, Cout)


# ---------------------------------------------------------------------------
# Fused ResBlock kernel:  out = relu?(relu(relu(A) @ W1 + b1) @ W2 + b2 + y)
# (residual y is the centre tap of the 3x3 patches, so it is read only once)
# ---------------------------------------------------------------------------
def _resblock_kernel(a_ref, w1_ref, b1_ref, w2_ref, b2_ref, o_ref, *,
                     cin, center_off, relu_out):
    a = a_ref[...]                                        # raw 3x3 patches of y
    residual = a[:, center_off:center_off + cin].astype(jnp.float32)
    h = jnp.dot(jnp.maximum(a, 0), w1_ref[...],
                preferred_element_type=jnp.float32)       # relu(y) @ W1
    h = jnp.maximum(h + b1_ref[...].astype(jnp.float32), 0.0)
    out = jnp.dot(h.astype(w2_ref.dtype), w2_ref[...],
                  preferred_element_type=jnp.float32)     # h @ W2
    out = out + b2_ref[...].astype(jnp.float32) + residual
    if relu_out:
        out = jnp.maximum(out, 0.0)
    o_ref[...] = out.astype(o_ref.dtype)


def resblock_nhwc(y, w1, b1, w2, b2, *, relu_out=False, tile_m=512):
    """Fused ResBlock: y + conv1x1(relu(conv3x3(relu(y)))) [+ trailing ReLU]."""
    N, H, W, C = y.shape
    C1 = w1.shape[0]                                      # n_res_channel
    M = N * H * W
    Kd = 9 * C

    a = _im2col_nhwc(y, 3, 3, 1, 1, H, W)                 # (M, 9*C)
    w1_mat = jnp.transpose(w1, (2, 3, 1, 0)).reshape(Kd, C1).astype(y.dtype)
    b1_row = b1.reshape(1, C1).astype(jnp.float32)
    w2_mat = jnp.transpose(w2, (2, 3, 1, 0)).reshape(C1, C).astype(y.dtype)
    b2_row = b2.reshape(1, C).astype(jnp.float32)

    tm, M_pad = _pick_tile(M, tile_m)
    if M_pad != M:
        a = jnp.pad(a, ((0, M_pad - M), (0, 0)))

    isz = jnp.dtype(y.dtype).itemsize
    cost = pl.CostEstimate(
        flops=2 * M_pad * Kd * C1 + 2 * M_pad * C1 * C,
        transcendentals=0,
        bytes_accessed=(M_pad * Kd * isz + (Kd * C1 + C1 * C) * isz
                        + (C1 + C) * 4 + M_pad * C * isz))

    kernel = functools.partial(_resblock_kernel, cin=C, center_off=4 * C,
                               relu_out=relu_out)
    out = pl.pallas_call(
        kernel,
        out_shape=jax.ShapeDtypeStruct((M_pad, C), y.dtype),
        grid_spec=pltpu.PrefetchScalarGridSpec(
            num_scalar_prefetch=0,
            grid=(M_pad // tm,),
            in_specs=[
                pl.BlockSpec((tm, Kd), lambda i: (i, 0)),      # patch tile
                pl.BlockSpec((Kd, C1), lambda i: (0, 0)),      # W1 (resident)
                pl.BlockSpec((1, C1), lambda i: (0, 0)),       # b1
                pl.BlockSpec((C1, C), lambda i: (0, 0)),       # W2 (resident)
                pl.BlockSpec((1, C), lambda i: (0, 0)),        # b2
            ],
            out_specs=pl.BlockSpec((tm, C), lambda i: (i, 0)),
        ),
        compiler_params=pltpu.CompilerParams(
            dimension_semantics=("parallel",)),
        cost_estimate=cost,
    )(a, w1_mat, b1_row, w2_mat, b2_row)

    return out[:M].reshape(N, H, W, C)


# ---------------------------------------------------------------------------
# Encoder: parameter construction mirroring the PyTorch constructor, and the
# forward pass expressed as a chain of fused Pallas kernels.
# ---------------------------------------------------------------------------
def _conv_init(key, cin, cout, k):
    wkey, bkey = jax.random.split(key)
    bound = 1.0 / math.sqrt(cin * k * k)
    w = jax.random.uniform(wkey, (cout, cin, k, k), jnp.float32, -bound, bound)
    b = jax.random.uniform(bkey, (cout,), jnp.float32, -bound, bound)
    return w, b


def init_encoder_params(key, in_channel, channel, n_res_block,
                        n_res_channel, stride):
    """Mirrors the PyTorch Encoder.__init__ layer structure."""
    def down4(cin):   # conv4s2 -> relu -> conv4s2 -> relu -> conv3s1
        return [(cin, channel // 2, 4, 2, 1, True),
                (channel // 2, channel, 4, 2, 1, True),
                (channel, channel, 3, 1, 1, False)]

    def down2(cin):   # conv4s2 -> relu -> conv3s1
        return [(cin, channel // 2, 4, 2, 1, True),
                (channel // 2, channel, 3, 1, 1, False)]

    layers = []
    if stride == 8:
        layers += down4(in_channel) + down4(channel)
    if stride == 6:
        layers += down2(in_channel) + down4(channel)
    elif stride == 4:
        layers += down4(in_channel)
    elif stride == 2:
        layers += down2(in_channel)

    down_w, down_cfg = [], []
    for (cin, cout, k, s, p, relu_after) in layers:
        key, sub = jax.random.split(key)
        down_w.append(_conv_init(sub, cin, cout, k))
        down_cfg.append((s, p, relu_after))

    res_w = []
    for _ in range(n_res_block):
        key, k1, k2 = jax.random.split(key, 3)
        res_w.append((_conv_init(k1, channel, n_res_channel, 3),
                      _conv_init(k2, n_res_channel, channel, 1)))

    return down_cfg, {"down": down_w, "res": res_w}


def encoder_forward_pallas(down_cfg, params, x, *, compute_dtype=jnp.bfloat16):
    # One layout + dtype change in, one out: NHWC bf16 across the encoder.
    y = jnp.transpose(x, (0, 2, 3, 1)).astype(compute_dtype)
    n_down = len(down_cfg)
    has_res = len(params["res"]) > 0
    for idx, ((w, b), (s, p, relu_after)) in enumerate(
            zip(params["down"], down_cfg)):
        # The Encoder's trailing ReLU folds into the last conv when there are
        # no ResBlocks.
        fuse_final_relu = (idx == n_down - 1) and not has_res
        y = conv2d_nhwc(y, w, b, stride=s, padding=p,
                        relu_out=relu_after or fuse_final_relu)
    for i, ((w1, b1), (w2, b2)) in enumerate(params["res"]):
        is_last = i == len(params["res"]) - 1
        # Last ResBlock also absorbs the Encoder's final ReLU.
        y = resblock_nhwc(y, w1, b1, w2, b2, relu_out=is_last)
    return jnp.transpose(y, (0, 3, 1, 2)).astype(x.dtype)


# ---------------------------------------------------------------------------
# Pure-JAX f32 reference matching PyTorch semantics.
# ---------------------------------------------------------------------------
def _conv2d_ref(x, w, b, stride, padding):
    out = jax.lax.conv_general_dilated(
        x, w, (stride, stride), ((padding, padding), (padding, padding)),
        dimension_numbers=("NCHW", "OIHW", "NCHW"))
    return out + b[None, :, None, None]


def encoder_forward_ref(down_cfg, params, x):
    y = x
    for (w, b), (s, p, relu_after) in zip(params["down"], down_cfg):
        y = _conv2d_ref(y, w, b, s, p)
        if relu_after:
            y = jax.nn.relu(y)
    for (w1, b1), (w2, b2) in params["res"]:
        h = jax.nn.relu(y)
        h = jax.nn.relu(_conv2d_ref(h, w1, b1, 1, 1))
        h = _conv2d_ref(h, w2, b2, 1, 0)
        y = y + h
    return jax.nn.relu(y)


if __name__ == "__main__":
    # Small shapes consistent with Encoder(in_channel, channel, n_res_block,
    # n_res_channel, stride): Encoder(3, 8, 2, 4, 4) on a (2, 3, 16, 16) input.
    N, in_channel, H, W = 2, 3, 16, 16
    channel, n_res_block, n_res_channel, stride = 8, 2, 4, 4

    key = jax.random.PRNGKey(0)
    key, pkey, xkey = jax.random.split(key, 3)
    down_cfg, params = init_encoder_params(
        pkey, in_channel, channel, n_res_block, n_res_channel, stride)
    x = jax.random.normal(xkey, (N, in_channel, H, W), dtype=jnp.float32)

    fwd = jax.jit(lambda inp: encoder_forward_pallas(down_cfg, params, inp))
    out = fwd(x)
    jax.block_until_ready(out)

    ref = encoder_forward_ref(down_cfg, params, x)
    assert out.shape == (N, channel, H // stride, W // stride), out.shape
    # bf16 MXU operands + bf16 inter-layer activations -> looser tolerance.
    np.testing.assert_allclose(np.asarray(out), np.asarray(ref),
                               rtol=2e-2, atol=2e-2)

    print("KERNEL_OK")
</pallas_src>

<mosaic_0001>
module attributes {stable_mosaic.version = 11 : i64} {
  func.func @_conv_mm_kernel(%arg0: i32, %arg1: memref<128x48xbf16, #tpu.memory_space<vmem>>, %arg2: memref<48x4xbf16, #tpu.memory_space<vmem>>, %arg3: memref<1x4xf32, #tpu.memory_space<vmem>>, %arg4: memref<128x4xbf16, #tpu.memory_space<vmem>>) attributes {dimension_semantics = [#tpu.dimension_semantics<parallel>], iteration_bounds = array<i64: 1>, scalar_prefetch = 0 : i64, scratch_operands = 0 : i64, tpu.core_type = #tpu.core_type<tc>, window_params = [{transform_indices = @transform_0, window_bounds = array<i64: 128, 48>}, {pipeline_mode = #tpu.pipeline_mode<synchronous>, transform_indices = @transform_1, window_bounds = array<i64: 48, 4>}, {pipeline_mode = #tpu.pipeline_mode<synchronous>, transform_indices = @transform_2, window_bounds = array<i64: 1, 4>}, {transform_indices = @transform_3, window_bounds = array<i64: 128, 4>}]} {
    %c0 = arith.constant 0 : index
    %c0_0 = arith.constant 0 : index
    %0 = vector.load %arg1[%c0, %c0_0] : memref<128x48xbf16, #tpu.memory_space<vmem>>, vector<128x48xbf16>
    %c0_1 = arith.constant 0 : index
    %c0_2 = arith.constant 0 : index
    %1 = vector.load %arg2[%c0_1, %c0_2] : memref<48x4xbf16, #tpu.memory_space<vmem>>, vector<48x4xbf16>
    %cst = arith.constant dense<0.000000e+00> : vector<128x4xf32>
    %2 = tpu.matmul %0, %1, %cst {dimension_numbers = #tpu.dot_dimension_numbers<[1], [0], [0], [1], [0, 0, 1, 1], [], []>} : vector<128x48xbf16>, vector<48x4xbf16>, vector<128x4xf32> -> vector<128x4xf32>
    %c0_3 = arith.constant 0 : index
    %c0_4 = arith.constant 0 : index
    %3 = vector.load %arg3[%c0_3, %c0_4] : memref<1x4xf32, #tpu.memory_space<vmem>>, vector<1x4xf32>
    %4 = vector.broadcast %3 : vector<1x4xf32> to vector<128x4xf32>
    %5 = arith.addf %2, %4 : vector<128x4xf32>
    %cst_5 = arith.constant 0.000000e+00 : f32
    %6 = vector.broadcast %cst_5 : f32 to vector<128x4xf32>
    %7 = arith.maximumf %5, %6 : vector<128x4xf32>
    %8 = arith.truncf %7 : vector<128x4xf32> to vector<128x4xbf16>
    %c0_6 = arith.constant 0 : index
    %c0_7 = arith.constant 0 : index
    %9 = vector.load %arg4[%c0_6, %c0_7] : memref<128x4xbf16, #tpu.memory_space<vmem>>, vector<128x4xbf16>
    tpu.vector_store %arg4[%c0_6, %c0_7], %8 {strides = array<i32>} : memref<128x4xbf16, #tpu.memory_space<vmem>>, vector<128x4xbf16>,
    return
  }
  func.func @transform_0(%arg0: i32) -> (i32, i32) {
    %c0_i32 = arith.constant 0 : i32
    %c0_i32_0 = arith.constant 0 : i32
    return %arg0, %c0_i32 : i32, i32
  }
  func.func @transform_1(%arg0: i32) -> (i32, i32) {
    %c0_i32 = arith.constant 0 : i32
    %c0_i32_0 = arith.constant 0 : i32
    %c0_i32_1 = arith.constant 0 : i32
    return %c0_i32, %c0_i32_0 : i32, i32
  }
  func.func @transform_2(%arg0: i32) -> (i32, i32) {
    %c0_i32 = arith.constant 0 : i32
    %c0_i32_0 = arith.constant 0 : i32
    %c0_i32_1 = arith.constant 0 : i32
    return %c0_i32, %c0_i32_0 : i32, i32
  }
  func.func @transform_3(%arg0: i32) -> (i32, i32) {
    %c0_i32 = arith.constant 0 : i32
    %c0_i32_0 = arith.constant 0 : i32
    return %arg0, %c0_i32 : i32, i32
  }
}

module attributes {stable_mosaic.version = 11 : i64} {
  func.func @_conv_mm_kernel(%arg0: i32, %arg1: memref<32x64xbf16, #tpu.memory_space<vmem>>, %arg2: memref<64x8xbf16, #tpu.memory_space<vmem>>, %arg3: memref<1x8xf32, #tpu.memory_space<vmem>>, %arg4: memref<32x8xbf16, #tpu.memory_space<vmem>>) attributes {dimension_semantics = [#tpu.dimension_semantics<parallel>], iteration_bounds = array<i64: 1>, scalar_prefetch = 0 : i64, scratch_operands = 0 : i64, tpu.core_type = #tpu.core_type<tc>, window_params = [{transform_indices = @transform_0, window_bounds = array<i64: 32, 64>}, {pipeline_mode = #tpu.pipeline_mode<synchronous>, transform_indices = @transform_1, window_bounds = array<i64: 64, 8>}, {pipeline_mode = #tpu.pipeline_mode<synchronous>, transform_indices = @transform_2, window_bounds = array<i64: 1, 8>}, {transform_indices = @transform_3, window_bounds = array<i64: 32, 8>}]} {
    %c0 = arith.constant 0 : index
    %c0_0 = arith.constant 0 : index
    %0 = vector.load %arg1[%c0, %c0_0] : memref<32x64xbf16, #tpu.memory_space<vmem>>, vector<32x64xbf16>
    %c0_1 = arith.constant 0 : index
    %c0_2 = arith.constant 0 : index
    %1 = vector.load %arg2[%c0_1, %c0_2] : memref<64x8xbf16, #tpu.memory_space<vmem>>, vector<64x8xbf16>
    %cst = arith.constant dense<0.000000e+00> : vector<32x8xf32>
    %2 = tpu.matmul %0, %1, %cst {dimension_numbers = #tpu.dot_dimension_numbers<[1], [0], [0], [1], [0, 0, 1, 1], [], []>} : vector<32x64xbf16>, vector<64x8xbf16>, vector<32x8xf32> -> vector<32x8xf32>
    %c0_3 = arith.constant 0 : index
    %c0_4 = arith.constant 0 : index
    %3 = vector.load %arg3[%c0_3, %c0_4] : memref<1x8xf32, #tpu.memory_space<vmem>>, vector<1x8xf32>
    %4 = vector.broadcast %3 : vector<1x8xf32> to vector<32x8xf32>
    %5 = arith.addf %2, %4 : vector<32x8xf32>
    %cst_5 = arith.constant 0.000000e+00 : f32
    %6 = vector.broadcast %cst_5 : f32 to vector<32x8xf32>
    %7 = arith.maximumf %5, %6 : vector<32x8xf32>
    %8 = arith.truncf %7 : vector<32x8xf32> to vector<32x8xbf16>
    %c0_6 = arith.constant 0 : index
    %c0_7 = arith.constant 0 : index
    %9 = vector.load %arg4[%c0_6, %c0_7] : memref<32x8xbf16, #tpu.memory_space<vmem>>, vector<32x8xbf16>
    tpu.vector_store %arg4[%c0_6, %c0_7], %8 {strides = array<i32>} : memref<32x8xbf16, #tpu.memory_space<vmem>>, vector<32x8xbf16>,
    return
  }
  func.func @transform_0(%arg0: i32) -> (i32, i32) {
    %c0_i32 = arith.constant 0 : i32
    %c0_i32_0 = arith.constant 0 : i32
    return %arg0, %c0_i32 : i32, i32
  }
  func.func @transform_1(%arg0: i32) -> (i32, i32) {
    %c0_i32 = arith.constant 0 : i32
    %c0_i32_0 = arith.constant 0 : i32
    %c0_i32_1 = arith.constant 0 : i32
    return %c0_i32, %c0_i32_0 : i32, i32
  }
  func.func @transform_2(%arg0: i32) -> (i32, i32) {
    %c0_i32 = arith.constant 0 : i32
    %c0_i32_0 = arith.constant 0 : i32
    %c0_i32_1 = arith.constant 0 : i32
    return %c0_i32, %c0_i32_0 : i32, i32
  }
  func.func @transform_3(%arg0: i32) -> (i32, i32) {
    %c0_i32 = arith.constant 0 : i32
    %c0_i32_0 = arith.constant 0 : i32
    return %arg0, %c0_i32 : i32, i32
  }
}

module attributes {stable_mosaic.version = 11 : i64} {
  func.func @_conv_mm_kernel(%arg0: i32, %arg1: memref<32x72xbf16, #tpu.memory_space<vmem>>, %arg2: memref<72x8xbf16, #tpu.memory_space<vmem>>, %arg3: memref<1x8xf32, #tpu.memory_space<vmem>>, %arg4: memref<32x8xbf16, #tpu.memory_space<vmem>>) attributes {dimension_semantics = [#tpu.dimension_semantics<parallel>], iteration_bounds = array<i64: 1>, scalar_prefetch = 0 : i64, scratch_operands = 0 : i64, tpu.core_type = #tpu.core_type<tc>, window_params = [{transform_indices = @transform_0, window_bounds = array<i64: 32, 72>}, {pipeline_mode = #tpu.pipeline_mode<synchronous>, transform_indices = @transform_1, window_bounds = array<i64: 72, 8>}, {pipeline_mode = #tpu.pipeline_mode<synchronous>, transform_indices = @transform_2, window_bounds = array<i64: 1, 8>}, {transform_indices = @transform_3, window_bounds = array<i64: 32, 8>}]} {
    %c0 = arith.constant 0 : index
    %c0_0 = arith.constant 0 : index
    %0 = vector.load %arg1[%c0, %c0_0] : memref<32x72xbf16, #tpu.memory_space<vmem>>, vector<32x72xbf16>
    %c0_1 = arith.constant 0 : index
    %c0_2 = arith.constant 0 : index
    %1 = vector.load %arg2[%c0_1, %c0_2] : memref<72x8xbf16, #tpu.memory_space<vmem>>, vector<72x8xbf16>
    %cst = arith.constant dense<0.000000e+00> : vector<32x8xf32>
    %2 = tpu.matmul %0, %1, %cst {dimension_numbers = #tpu.dot_dimension_numbers<[1], [0], [0], [1], [0, 0, 1, 1], [], []>} : vector<32x72xbf16>, vector<72x8xbf16>, vector<32x8xf32> -> vector<32x8xf32>
    %c0_3 = arith.constant 0 : index
    %c0_4 = arith.constant 0 : index
    %3 = vector.load %arg3[%c0_3, %c0_4] : memref<1x8xf32, #tpu.memory_space<vmem>>, vector<1x8xf32>
    %4 = vector.broadcast %3 : vector<1x8xf32> to vector<32x8xf32>
    %5 = arith.addf %2, %4 : vector<32x8xf32>
    %6 = arith.truncf %5 : vector<32x8xf32> to vector<32x8xbf16>
    %c0_5 = arith.constant 0 : index
    %c0_6 = arith.constant 0 : index
    %7 = vector.load %arg4[%c0_5, %c0_6] : memref<32x8xbf16, #tpu.memory_space<vmem>>, vector<32x8xbf16>
    tpu.vector_store %arg4[%c0_5, %c0_6], %6 {strides = array<i32>} : memref<32x8xbf16, #tpu.memory_space<vmem>>, vector<32x8xbf16>,
    return
  }
  func.func @transform_0(%arg0: i32) -> (i32, i32) {
    %c0_i32 = arith.constant 0 : i32
    %c0_i32_0 = arith.constant 0 : i32
    return %arg0, %c0_i32 : i32, i32
  }
  func.func @transform_1(%arg0: i32) -> (i32, i32) {
    %c0_i32 = arith.constant 0 : i32
    %c0_i32_0 = arith.constant 0 : i32
    %c0_i32_1 = arith.constant 0 : i32
    return %c0_i32, %c0_i32_0 : i32, i32
  }
  func.func @transform_2(%arg0: i32) -> (i32, i32) {
    %c0_i32 = arith.constant 0 : i32
    %c0_i32_0 = arith.constant 0 : i32
    %c0_i32_1 = arith.constant 0 : i32
    return %c0_i32, %c0_i32_0 : i32, i32
  }
  func.func @transform_3(%arg0: i32) -> (i32, i32) {
    %c0_i32 = arith.constant 0 : i32
    %c0_i32_0 = arith.constant 0 : i32
    return %arg0, %c0_i32 : i32, i32
  }
}

module attributes {stable_mosaic.version = 11 : i64} {
  func.func @_resblock_kernel(%arg0: i32, %arg1: memref<32x72xbf16, #tpu.memory_space<vmem>>, %arg2: memref<72x4xbf16, #tpu.memory_space<vmem>>, %arg3: memref<1x4xf32, #tpu.memory_space<vmem>>, %arg4: memref<4x8xbf16, #tpu.memory_space<vmem>>, %arg5: memref<1x8xf32, #tpu.memory_space<vmem>>, %arg6: memref<32x8xbf16, #tpu.memory_space<vmem>>) attributes {dimension_semantics = [#tpu.dimension_semantics<parallel>], iteration_bounds = array<i64: 1>, scalar_prefetch = 0 : i64, scratch_operands = 0 : i64, tpu.core_type = #tpu.core_type<tc>, window_params = [{transform_indices = @transform_0, window_bounds = array<i64: 32, 72>}, {pipeline_mode = #tpu.pipeline_mode<synchronous>, transform_indices = @transform_1, window_bounds = array<i64: 72, 4>}, {pipeline_mode = #tpu.pipeline_mode<synchronous>, transform_indices = @transform_2, window_bounds = array<i64: 1, 4>}, {pipeline_mode = #tpu.pipeline_mode<synchronous>, transform_indices = @transform_3, window_bounds = array<i64: 4, 8>}, {pipeline_mode = #tpu.pipeline_mode<synchronous>, transform_indices = @transform_4, window_bounds = array<i64: 1, 8>}, {transform_indices = @transform_5, window_bounds = array<i64: 32, 8>}]} {
    %c0 = arith.constant 0 : index
    %c0_0 = arith.constant 0 : index
    %0 = vector.load %arg1[%c0, %c0_0] : memref<32x72xbf16, #tpu.memory_space<vmem>>, vector<32x72xbf16>
    %1 = vector.extract_strided_slice %0 {offsets = [0, 32], sizes = [32, 8], strides = [1, 1]} : vector<32x72xbf16> to vector<32x8xbf16>
    %2 = arith.extf %1 : vector<32x8xbf16> to vector<32x8xf32>
    %cst = arith.constant 0.000000e+00 : bf16
    %3 = vector.broadcast %cst : bf16 to vector<32x72xbf16>
    %4 = arith.maximumf %0, %3 : vector<32x72xbf16>
    %c0_1 = arith.constant 0 : index
    %c0_2 = arith.constant 0 : index
    %5 = vector.load %arg2[%c0_1, %c0_2] : memref<72x4xbf16, #tpu.memory_space<vmem>>, vector<72x4xbf16>
    %cst_3 = arith.constant dense<0.000000e+00> : vector<32x4xf32>
    %6 = tpu.matmul %4, %5, %cst_3 {dimension_numbers = #tpu.dot_dimension_numbers<[1], [0], [0], [1], [0, 0, 1, 1], [], []>} : vector<32x72xbf16>, vector<72x4xbf16>, vector<32x4xf32> -> vector<32x4xf32>
    %c0_4 = arith.constant 0 : index
    %c0_5 = arith.constant 0 : index
    %7 = vector.load %arg3[%c0_4, %c0_5] : memref<1x4xf32, #tpu.memory_space<vmem>>, vector<1x4xf32>
    %8 = vector.broadcast %7 : vector<1x4xf32> to vector<32x4xf32>
    %9 = arith.addf %6, %8 : vector<32x4xf32>
    %cst_6 = arith.constant 0.000000e+00 : f32
    %10 = vector.broadcast %cst_6 : f32 to vector<32x4xf32>
    %11 = arith.maximumf %9, %10 : vector<32x4xf32>
    %12 = arith.truncf %11 : vector<32x4xf32> to vector<32x4xbf16>
    %c0_7 = arith.constant 0 : index
    %c0_8 = arith.constant 0 : index
    %13 = vector.load %arg4[%c0_7, %c0_8] : memref<4x8xbf16, #tpu.memory_space<vmem>>, vector<4x8xbf16>
    %cst_9 = arith.constant dense<0.000000e+00> : vector<32x8xf32>
    %14 = tpu.matmul %12, %13, %cst_9 {dimension_numbers = #tpu.dot_dimension_numbers<[1], [0], [0], [1], [0, 0, 1, 1], [], []>} : vector<32x4xbf16>, vector<4x8xbf16>, vector<32x8xf32> -> vector<32x8xf32>
    %c0_10 = arith.constant 0 : index
    %c0_11 = arith.constant 0 : index
    %15 = vector.load %arg5[%c0_10, %c0_11] : memref<1x8xf32, #tpu.memory_space<vmem>>, vector<1x8xf32>
    %16 = vector.broadcast %15 : vector<1x8xf32> to vector<32x8xf32>
    %17 = arith.addf %14, %16 : vector<32x8xf32>
    %18 = arith.addf %17, %2 : vector<32x8xf32>
    %19 = arith.truncf %18 : vector<32x8xf32> to vector<32x8xbf16>
    %c0_12 = arith.constant 0 : index
    %c0_13 = arith.constant 0 : index
    %20 = vector.load %arg6[%c0_12, %c0_13] : memref<32x8xbf16, #tpu.memory_space<vmem>>, vector<32x8xbf16>
    tpu.vector_store %arg6[%c0_12, %c0_13], %19 {strides = array<i32>} : memref<32x8xbf16, #tpu.memory_space<vmem>>, vector<32x8xbf16>,
    return
  }
  func.func @transform_0(%arg0: i32) -> (i32, i32) {
    %c0_i32 = arith.constant 0 : i32
    %c0_i32_0 = arith.constant 0 : i32
    return %arg0, %c0_i32 : i32, i32
  }
  func.func @transform_1(%arg0: i32) -> (i32, i32) {
    %c0_i32 = arith.constant 0 : i32
    %c0_i32_0 = arith.constant 0 : i32
    %c0_i32_1 = arith.constant 0 : i32
    return %c0_i32, %c0_i32_0 : i32, i32
  }
  func.func @transform_2(%arg0: i32) -> (i32, i32) {
    %c0_i32 = arith.constant 0 : i32
    %c0_i32_0 = arith.constant 0 : i32
    %c0_i32_1 = arith.constant 0 : i32
    return %c0_i32, %c0_i32_0 : i32, i32
  }
  func.func @transform_3(%arg0: i32) -> (i32, i32) {
    %c0_i32 = arith.constant 0 : i32
    %c0_i32_0 = arith.constant 0 : i32
    %c0_i32_1 = arith.constant 0 : i32
    return %c0_i32, %c0_i32_0 : i32, i32
  }
  func.func @transform_4(%arg0: i32) -> (i32, i32) {
    %c0_i32 = arith.constant 0 : i32
    %c0_i32_0 = arith.constant 0 : i32
    %c0_i32_1 = arith.constant 0 : i32
    return %c0_i32, %c0_i32_0 : i32, i32
  }
  func.func @transform_5(%arg0: i32) -> (i32, i32) {
    %c0_i32 = arith.constant 0 : i32
    %c0_i32_0 = arith.constant 0 : i32
    return %arg0, %c0_i32 : i32, i32
  }
}

module attributes {stable_mosaic.version = 11 : i64} {
  func.func @_resblock_kernel(%arg0: i32, %arg1: memref<32x72xbf16, #tpu.memory_space<vmem>>, %arg2: memref<72x4xbf16, #tpu.memory_space<vmem>>, %arg3: memref<1x4xf32, #tpu.memory_space<vmem>>, %arg4: memref<4x8xbf16, #tpu.memory_space<vmem>>, %arg5: memref<1x8xf32, #tpu.memory_space<vmem>>, %arg6: memref<32x8xbf16, #tpu.memory_space<vmem>>) attributes {dimension_semantics = [#tpu.dimension_semantics<parallel>], iteration_bounds = array<i64: 1>, scalar_prefetch = 0 : i64, scratch_operands = 0 : i64, tpu.core_type = #tpu.core_type<tc>, window_params = [{transform_indices = @transform_0, window_bounds = array<i64: 32, 72>}, {pipeline_mode = #tpu.pipeline_mode<synchronous>, transform_indices = @transform_1, window_bounds = array<i64: 72, 4>}, {pipeline_mode = #tpu.pipeline_mode<synchronous>, transform_indices = @transform_2, window_bounds = array<i64: 1, 4>}, {pipeline_mode = #tpu.pipeline_mode<synchronous>, transform_indices = @transform_3, window_bounds = array<i64: 4, 8>}, {pipeline_mode = #tpu.pipeline_mode<synchronous>, transform_indices = @transform_4, window_bounds = array<i64: 1, 8>}, {transform_indices = @transform_5, window_bounds = array<i64: 32, 8>}]} {
    %c0 = arith.constant 0 : index
    %c0_0 = arith.constant 0 : index
    %0 = vector.load %arg1[%c0, %c0_0] : memref<32x72xbf16, #tpu.memory_space<vmem>>, vector<32x72xbf16>
    %1 = vector.extract_strided_slice %0 {offsets = [0, 32], sizes = [32, 8], strides = [1, 1]} : vector<32x72xbf16> to vector<32x8xbf16>
    %2 = arith.extf %1 : vector<32x8xbf16> to vector<32x8xf32>
    %cst = arith.constant 0.000000e+00 : bf16
    %3 = vector.broadcast %cst : bf16 to vector<32x72xbf16>
    %4 = arith.maximumf %0, %3 : vector<32x72xbf16>
    %c0_1 = arith.constant 0 : index
    %c0_2 = arith.constant 0 : index
    %5 = vector.load %arg2[%c0_1, %c0_2] : memref<72x4xbf16, #tpu.memory_space<vmem>>, vector<72x4xbf16>
    %cst_3 = arith.constant dense<0.000000e+00> : vector<32x4xf32>
    %6 = tpu.matmul %4, %5, %cst_3 {dimension_numbers = #tpu.dot_dimension_numbers<[1], [0], [0], [1], [0, 0, 1, 1], [], []>} : vector<32x72xbf16>, vector<72x4xbf16>, vector<32x4xf32> -> vector<32x4xf32>
    %c0_4 = arith.constant 0 : index
    %c0_5 = arith.constant 0 : index
    %7 = vector.load %arg3[%c0_4, %c0_5] : memref<1x4xf32, #tpu.memory_space<vmem>>, vector<1x4xf32>
    %8 = vector.broadcast %7 : vector<1x4xf32> to vector<32x4xf32>
    %9 = arith.addf %6, %8 : vector<32x4xf32>
    %cst_6 = arith.constant 0.000000e+00 : f32
    %10 = vector.broadcast %cst_6 : f32 to vector<32x4xf32>
    %11 = arith.maximumf %9, %10 : vector<32x4xf32>
    %12 = arith.truncf %11 : vector<32x4xf32> to vector<32x4xbf16>
    %c0_7 = arith.constant 0 : index
    %c0_8 = arith.constant 0 : index
    %13 = vector.load %arg4[%c0_7, %c0_8] : memref<4x8xbf16, #tpu.memory_space<vmem>>, vector<4x8xbf16>
    %cst_9 = arith.constant dense<0.000000e+00> : vector<32x8xf32>
    %14 = tpu.matmul %12, %13, %cst_9 {dimension_numbers = #tpu.dot_dimension_numbers<[1], [0], [0], [1], [0, 0, 1, 1], [], []>} : vector<32x4xbf16>, vector<4x8xbf16>, vector<32x8xf32> -> vector<32x8xf32>
    %c0_10 = arith.constant 0 : index
    %c0_11 = arith.constant 0 : index
    %15 = vector.load %arg5[%c0_10, %c0_11] : memref<1x8xf32, #tpu.memory_space<vmem>>, vector<1x8xf32>
    %16 = vector.broadcast %15 : vector<1x8xf32> to vector<32x8xf32>
    %17 = arith.addf %14, %16 : vector<32x8xf32>
    %18 = arith.addf %17, %2 : vector<32x8xf32>
    %cst_12 = arith.constant 0.000000e+00 : f32
    %19 = vector.broadcast %cst_12 : f32 to vector<32x8xf32>
    %20 = arith.maximumf %18, %19 : vector<32x8xf32>
    %21 = arith.truncf %20 : vector<32x8xf32> to vector<32x8xbf16>
    %c0_13 = arith.constant 0 : index
    %c0_14 = arith.constant 0 : index
    %22 = vector.load %arg6[%c0_13, %c0_14] : memref<32x8xbf16, #tpu.memory_space<vmem>>, vector<32x8xbf16>
    tpu.vector_store %arg6[%c0_13, %c0_14], %21 {strides = array<i32>} : memref<32x8xbf16, #tpu.memory_space<vmem>>, vector<32x8xbf16>,
    return
  }
  func.func @transform_0(%arg0: i32) -> (i32, i32) {
    %c0_i32 = arith.constant 0 : i32
    %c0_i32_0 = arith.constant 0 : i32
    return %arg0, %c0_i32 : i32, i32
  }
  func.func @transform_1(%arg0: i32) -> (i32, i32) {
    %c0_i32 = arith.constant 0 : i32
    %c0_i32_0 = arith.constant 0 : i32
    %c0_i32_1 = arith.constant 0 : i32
    return %c0_i32, %c0_i32_0 : i32, i32
  }
  func.func @transform_2(%arg0: i32) -> (i32, i32) {
    %c0_i32 = arith.constant 0 : i32
    %c0_i32_0 = arith.constant 0 : i32
    %c0_i32_1 = arith.constant 0 : i32
    return %c0_i32, %c0_i32_0 : i32, i32
  }
  func.func @transform_3(%arg0: i32) -> (i32, i32) {
    %c0_i32 = arith.constant 0 : i32
    %c0_i32_0 = arith.constant 0 : i32
    %c0_i32_1 = arith.constant 0 : i32
    return %c0_i32, %c0_i32_0 : i32, i32
  }
  func.func @transform_4(%arg0: i32) -> (i32, i32) {
    %c0_i32 = arith.constant 0 : i32
    %c0_i32_0 = arith.constant 0 : i32
    %c0_i32_1 = arith.constant 0 : i32
    return %c0_i32, %c0_i32_0 : i32, i32
  }
  func.func @transform_5(%arg0: i32) -> (i32, i32) {
    %c0_i32 = arith.constant 0 : i32
    %c0_i32_0 = arith.constant 0 : i32
    return %arg0, %c0_i32 : i32, i32
  }
}

</mosaic_0001>

<bundles_post_ra>
// kernel: _lambda_.5
= control target key start
LH: loop header
LB: loop body
LE: loop exit
PB: predicated region body
PF: predicated region fallthrough
CT: control target
= control target key end

     0   :  { %vm99_vm0 = vcmask 392192   ;;  %vm205_vm1 = vcmask 27648   ;;  %s445_s1 = inlined_call_operand.vmem [shape: bf16[48,4], index: 1, kind: input, shape index: {}]   ;;  %s446_s2 = inlined_call_operand.vmem [shape: f32[1,4], index: 2, kind: input, shape index: {}]   ;;  %s447_s0 = inlined_call_operand.vmem [shape: bf16[128,48], index: 0, kind: input, shape index: {}]   ;;  %s448_s3 = inlined_call_operand.vmem [shape: bf16[128,4], index: 3, kind: output, shape index: {}]  }
   0x1   :  { %v288_v0 = vld [vmem:[%s445_s1 + $0x10] sm:$0xff]  ;;  %v287_v1 = vld [vmem:[%s445_s1 + $0x8] sm:$0xff]  ;;  %v286_v2 = vld [vmem:[%s445_s1] sm:$0xff] }
   0x2   :  { %129 = vmatpush.bf16.msra.mxu0 %v288_v0  ;;  %289 = vmatpush.bf16.msra.mxu1 %v288_v0  ;;  %v278_v3 = vld [vmem:[%s447_s0] sm:$0xff]  ;;  %v280_v4 = vld [vmem:[%s447_s0 + $0x10] sm:$0xff]  ;;  %v279_v7 = vld [vmem:[%s447_s0 + $0x8] sm:$0xff] }
   0x3   :  { %290 = vmatpush.bf16.msra.mxu2 %v288_v0  ;;  %291 = vmatpush.bf16.msra.mxu3 %v288_v0  ;;  %v282_v5 = vld [vmem:[%s447_s0 + $0x20] sm:$0xff]  ;;  %v284_v6 = vld [vmem:[%s447_s0 + $0x30] sm:$0xff]  ;;  %v281_v8 = vld [vmem:[%s447_s0 + $0x18] sm:$0xff] }
   0x4   :  { %v283_v9 = vld [vmem:[%s447_s0 + $0x28] sm:$0xff]  ;;  %v285_v10 = vld [vmem:[%s447_s0 + $0x38] sm:$0xff]  ;;  %v363_v11 = vld [vmem:[%s446_s2] ss:$0 sm:$0xff] }
   0x6   :  { %130 = vmatpush.bf16.msra.mxu0 %v287_v1  ;;  %292 = vmatpush.bf16.msra.mxu1 %v287_v1 }
   0x7   :  { %293 = vmatpush.bf16.msra.mxu2 %v287_v1  ;;  %294 = vmatpush.bf16.msra.mxu3 %v287_v1 }
   0xa   :  { %131 = vmatpush.bf16.msra.mxu0 %v286_v2  ;;  %295 = vmatpush.bf16.msra.mxu1 %v286_v2 }
   0xb   :  { %296 = vmatpush.bf16.msra.mxu2 %v286_v2  ;;  %297 = vmatpush.bf16.msra.mxu3 %v286_v2 }
   0xd   :  { %270 = vmatmul.msk.bf16.vlgmr.msra.gmra.mxu0 %vm99_vm0, %v278_v3  ;;  %272 = vmatmul.msk.bf16.vlgmr.msra.gmra.mxu1 %vm99_vm0, %v280_v4 }
   0xe   :  { %274 = vmatmul.msk.bf16.vlgmr.msra.gmra.mxu2 %vm99_vm0, %v282_v5  ;;  %276 = vmatmul.msk.bf16.vlgmr.msra.gmra.mxu3 %vm99_vm0, %v284_v6 }
  0x1d   :  { %271 = vmatmul.msk.bf16.gmra.mxu0 %vm99_vm0, %v279_v7  ;;  %273 = vmatmul.msk.bf16.gmra.mxu1 %vm99_vm0, %v281_v8 }
  0x1e   :  { %275 = vmatmul.msk.bf16.gmra.mxu2 %vm99_vm0, %v283_v9  ;;  %277 = vmatmul.msk.bf16.gmra.mxu3 %vm99_vm0, %v285_v10 }
  0x8a   :  { %v133_v12 = vpop.f32.mrf.mxu0  ;;  %v143_v13 = vpop.f32.mrf.mxu1 }
  0x8b   :  { %v134_v14 = vadd.f32 %v363_v11, %v133_v12  ;;  %v144_v15 = vadd.f32 %v363_v11, %v143_v13 }
  0x8d   :  { %v173_v16 = vmax.f32 %v134_v14, 0.0  ;;  %v177_v17 = vmax.f32 %v144_v15, 0.0 }
  0x8f   :  { %v189_v18 = vpack.c.bf16 %v173_v16, %v173_v16  ;;  %v193_v19 = vpack.c.bf16 %v177_v17, %v177_v17 }
  0x91   :  { %206 = vst.msk [vmem:[%s448_s3] sm:$0xf] %vm205_vm1, %v189_v18  ;;  %v153_v20 = vpop.f32.mrf.mxu2  ;;  %v163_v21 = vpop.f32.mrf.mxu3 }
  0x92   :  { %210 = vst.msk [vmem:[%s448_s3 + $0x10] sm:$0xf] %vm205_vm1, %v193_v19  ;;  %v154_v22 = vadd.f32 %v363_v11, %v153_v20  ;;  %v164_v23 = vadd.f32 %v363_v11, %v163_v21  ;;  %v135_v24 = vpop.f32.mrf.mxu0  ;;  %v145_v25 = vpop.f32.mrf.mxu1 }
  0x93   :  { %v136_v26 = vadd.f32 %v363_v11, %v135_v24  ;;  %v146_v27 = vadd.f32 %v363_v11, %v145_v25 }
  0x94   :  { %v181_v28 = vmax.f32 %v154_v22, 0.0  ;;  %v185_v29 = vmax.f32 %v164_v23, 0.0 }
  0x95   :  { %v174_v30 = vmax.f32 %v136_v26, 0.0  ;;  %v178_v31 = vmax.f32 %v146_v27, 0.0 }
  0x96   :  { %v197_v32 = vpack.c.bf16 %v181_v28, %v181_v28  ;;  %v201_v33 = vpack.c.bf16 %v185_v29, %v185_v29 }
  0x97   :  { %v190_v34 = vpack.c.bf16 %v174_v30, %v174_v30  ;;  %v194_v35 = vpack.c.bf16 %v178_v31, %v178_v31 }
  0x98   :  { %214 = vst.msk [vmem:[%s448_s3 + $0x20] sm:$0xf] %vm205_vm1, %v197_v32 }
  0x99   :  { %218 = vst.msk [vmem:[%s448_s3 + $0x30] sm:$0xf] %vm205_vm1, %v201_v33  ;;  %v155_v36 = vpop.f32.mrf.mxu2  ;;  %v165_v37 = vpop.f32.mrf.mxu3 }
  0x9a   :  { %207 = vst.msk [vmem:[%s448_s3 + $0x4] sm:$0xf] %vm205_vm1, %v190_v34  ;;  %v156_v38 = vadd.f32 %v363_v11, %v155_v36  ;;  %v166_v39 = vadd.f32 %v363_v11, %v165_v37  ;;  %v138_v40 = vpop.f32.mrf.mxu0  ;;  %v148_v41 = vpop.f32.mrf.mxu1 }
  0x9b   :  { %211 = vst.msk [vmem:[%s448_s3 + $0x14] sm:$0xf] %vm205_vm1, %v194_v35  ;;  %v139_v42 = vadd.f32 %v363_v11, %v138_v40  ;;  %v149_v43 = vadd.f32 %v363_v11, %v148_v41 }
  0x9c   :  { %v182_v44 = vmax.f32 %v156_v38, 0.0  ;;  %v186_v45 = vmax.f32 %v166_v39, 0.0 }
  0x9d   :  { %v175_v46 = vmax.f32 %v139_v42, 0.0  ;;  %v179_v47 = vmax.f32 %v149_v43, 0.0 }
  0x9e   :  { %v198_v48 = vpack.c.bf16 %v182_v44, %v182_v44  ;;  %v202_v49 = vpack.c.bf16 %v186_v45, %v186_v45 }
  0x9f   :  { %v191_v50 = vpack.c.bf16 %v175_v46, %v175_v46  ;;  %v195_v51 = vpack.c.bf16 %v179_v47, %v179_v47 }
  0xa0   :  { %215 = vst.msk [vmem:[%s448_s3 + $0x24] sm:$0xf] %vm205_vm1, %v198_v48 }
  0xa1   :  { %219 = vst.msk [vmem:[%s448_s3 + $0x34] sm:$0xf] %vm205_vm1, %v202_v49  ;;  %v158_v52 = vpop.f32.mrf.mxu2  ;;  %v168_v53 = vpop.f32.mrf.mxu3 }
  0xa2   :  { %208 = vst.msk [vmem:[%s448_s3 + $0x8] sm:$0xf] %vm205_vm1, %v191_v50  ;;  %v159_v54 = vadd.f32 %v363_v11, %v158_v52  ;;  %v169_v55 = vadd.f32 %v363_v11, %v168_v53  ;;  %v140_v56 = vpop.f32.mrf.mxu0  ;;  %v150_v57 = vpop.f32.mrf.mxu1 }
  0xa3   :  { %212 = vst.msk [vmem:[%s448_s3 + $0x18] sm:$0xf] %vm205_vm1, %v195_v51  ;;  %v141_v58 = vadd.f32 %v363_v11, %v140_v56  ;;  %v151_v59 = vadd.f32 %v363_v11, %v150_v57 }
  0xa4   :  { %v183_v60 = vmax.f32 %v159_v54, 0.0  ;;  %v187_v61 = vmax.f32 %v169_v55, 0.0 }
  0xa5   :  { %v176_v62 = vmax.f32 %v141_v58, 0.0  ;;  %v180_v63 = vmax.f32 %v151_v59, 0.0 }
  0xa6   :  { %v199_v0 = vpack.c.bf16 %v183_v60, %v183_v60  ;;  %v203_v1 = vpack.c.bf16 %v187_v61, %v187_v61 }
  0xa7   :  { %v192_v2 = vpack.c.bf16 %v176_v62, %v176_v62  ;;  %v196_v3 = vpack.c.bf16 %v180_v63, %v180_v63 }
  0xa8   :  { %216 = vst.msk [vmem:[%s448_s3 + $0x28] sm:$0xf] %vm205_vm1, %v199_v0 }
  0xa9   :  { %220 = vst.msk [vmem:[%s448_s3 + $0x38] sm:$0xf] %vm205_vm1, %v203_v1  ;;  %v160_v4 = vpop.f32.mrf.mxu2  ;;  %v170_v5 = vpop.f32.mrf.mxu3 }
  0xaa   :  { %209 = vst.msk [vmem:[%s448_s3 + $0xc] sm:$0xf] %vm205_vm1, %v192_v2  ;;  %v161_v6 = vadd.f32 %v363_v11, %v160_v4  ;;  %v171_v7 = vadd.f32 %v363_v11, %v170_v5 }
  0xab   :  { %213 = vst.msk [vmem:[%s448_s3 + $0x1c] sm:$0xf] %vm205_vm1, %v196_v3 }
  0xac   :  { %v184_v8 = vmax.f32 %v161_v6, 0.0  ;;  %v188_v9 = vmax.f32 %v171_v7, 0.0 }
  0xae   :  { %v200_v10 = vpack.c.bf16 %v184_v8, %v184_v8  ;;  %v204_v12 = vpack.c.bf16 %v188_v9, %v188_v9 }
  0xb0   :  { %217 = vst.msk [vmem:[%s448_s3 + $0x2c] sm:$0xf] %vm205_vm1, %v200_v10 }
  0xb1   :  { %221 = vst.msk [vmem:[%s448_s3 + $0x3c] sm:$0xf] %vm205_vm1, %v204_v12 }

// kernel: _lambda_.6
= control target key start
LH: loop header
LB: loop body
LE: loop exit
PB: predicated region body
PF: predicated region fallthrough
CT: control target
= control target key end

     0   :  { %vm65_vm0 = vcmask 523264   ;;  %vm99_vm1 = vcmask 60416   ;;  %s198_s1 = inlined_call_operand.vmem [shape: bf16[64,8], index: 1, kind: input, shape index: {}]   ;;  %s199_s2 = inlined_call_operand.vmem [shape: f32[1,8], index: 2, kind: input, shape index: {}]   ;;  %s200_s0 = inlined_call_operand.vmem [shape: bf16[32,64], index: 0, kind: input, shape index: {}]   ;;  %s201_s3 = inlined_call_operand.vmem [shape: bf16[32,8], index: 3, kind: output, shape index: {}]  }
   0x1   :  { %v139_v0 = vld [vmem:[%s198_s1 + $0x18] sm:$0xff]  ;;  %v138_v1 = vld [vmem:[%s198_s1 + $0x10] sm:$0xff]  ;;  %v137_v2 = vld [vmem:[%s198_s1 + $0x8] sm:$0xff] }
   0x2   :  { %76 = vmatpush.bf16.msra.mxu0 %v139_v0  ;;  %140 = vmatpush.bf16.msra.mxu1 %v139_v0  ;;  %v136_v3 = vld [vmem:[%s198_s1] sm:$0xff]  ;;  %v135_v5 = vld [vmem:[%s200_s0 + $0x8] sm:$0xff] }
   0x3   :  { %v134_v4 = vld [vmem:[%s200_s0] sm:$0xff] }
   0x4   :  { %v144_v6 = vld [vmem:[%s199_s2] ss:$0 sm:$0xff] }
   0x6   :  { %77 = vmatpush.bf16.msra.mxu0 %v138_v1  ;;  %141 = vmatpush.bf16.msra.mxu1 %v138_v1 }
   0xa   :  { %78 = vmatpush.bf16.msra.mxu0 %v137_v2  ;;  %142 = vmatpush.bf16.msra.mxu1 %v137_v2 }
   0xe   :  { %79 = vmatpush.bf16.msra.mxu0 %v136_v3  ;;  %143 = vmatpush.bf16.msra.mxu1 %v136_v3 }
  0x11   :  { %132 = vmatmul.msk.bf16.vlgmr.msra.gmra.mxu0 %vm65_vm0, %v134_v4  ;;  %133 = vmatmul.msk.bf16.vlgmr.msra.gmra.mxu1 %vm65_vm0, %v135_v5 }
  0x8e   :  { %v81_v7 = vpop.f32.mrf.mxu0  ;;  %v86_v8 = vpop.f32.mrf.mxu1 }
  0x8f   :  { %v82_v9 = vadd.f32 %v144_v6, %v81_v7  ;;  %v87_v10 = vadd.f32 %v144_v6, %v86_v8 }
  0x91   :  { %v91_v11 = vmax.f32 %v82_v9, 0.0  ;;  %v93_v12 = vmax.f32 %v87_v10, 0.0 }
  0x93   :  { %v95_v13 = vpack.c.bf16 %v91_v11, %v91_v11  ;;  %v97_v14 = vpack.c.bf16 %v93_v12, %v93_v12 }
  0x95   :  { %100 = vst.msk [vmem:[%s201_s3] sm:$0xf] %vm99_vm1, %v95_v13 }
  0x96   :  { %102 = vst.msk [vmem:[%s201_s3 + $0x8] sm:$0xf] %vm99_vm1, %v97_v14  ;;  %v83_v15 = vpop.f32.mrf.mxu0  ;;  %v88_v16 = vpop.f32.mrf.mxu1 }
  0x97   :  { %v84_v17 = vadd.f32 %v144_v6, %v83_v15  ;;  %v89_v18 = vadd.f32 %v144_v6, %v88_v16 }
  0x99   :  { %v92_v19 = vmax.f32 %v84_v17, 0.0  ;;  %v94_v20 = vmax.f32 %v89_v18, 0.0 }
  0x9b   :  { %v96_v21 = vpack.c.bf16 %v92_v19, %v92_v19  ;;  %v98_v22 = vpack.c.bf16 %v94_v20, %v94_v20 }
  0x9d   :  { %101 = vst.msk [vmem:[%s201_s3 + $0x4] sm:$0xf] %vm99_vm1, %v96_v21 }
  0x9e   :  { %103 = vst.msk [vmem:[%s201_s3 + $0xc] sm:$0xf] %vm99_vm1, %v98_v22 }

// kernel: _lambda_.7
= control target key start
LH: loop header
LB: loop body
LE: loop exit
PB: predicated region body
PF: predicated region fallthrough
CT: control target
= control target key end

     0   :  { %vm76_vm0 = vcmask 1043456   ;;  %vm69_vm1 = vcmask 588800   ;;  %vm103_vm2 = vcmask 60416   ;;  %s206_s1 = inlined_call_operand.vmem [shape: bf16[72,8], index: 1, kind: input, shape index: {}]   ;;  %s207_s2 = inlined_call_operand.vmem [shape: f32[1,8], index: 2, kind: input, shape index: {}]   ;;  %s208_s0 = inlined_call_operand.vmem [shape: bf16[32,72], index: 0, kind: input, shape index: {}]   ;;  %s209_s3 = inlined_call_operand.vmem [shape: bf16[32,8], index: 3, kind: output, shape index: {}]  }
   0x1   :  { %v27_v0 = vld [vmem:[%s206_s1 + $0x20] sm:$0xf]  ;;  %v143_v4 = vld [vmem:[%s206_s1 + $0x18] sm:$0xff]  ;;  %v142_v5 = vld [vmem:[%s206_s1 + $0x10] sm:$0xff] }
   0x2   :  { %v59_v1 = vunpack.c.l.b16 %v27_v0  ;;  %v141_v6 = vld [vmem:[%s206_s1 + $0x8] sm:$0xff]  ;;  %v140_v7 = vld [vmem:[%s206_s1] sm:$0xff] }
   0x3   :  { %v138_v8 = vld [vmem:[%s208_s0] sm:$0xff]  ;;  %v139_v9 = vld [vmem:[%s208_s0 + $0x8] sm:$0xff] }
   0x4   :  { %v64_v2 = vpack.c.b16 %v59_v1, %v59_v1  ;;  %v149_v10 = vld [vmem:[%s207_s2] ss:$0 sm:$0xff] }
   0x6   :  { %v78_v3 = vsel %vm76_vm0, %v64_v2, 0 }
   0x7   :  { %83 = vmatpush.bf16.msra.mxu0 %v78_v3  ;;  %144 = vmatpush.bf16.msra.mxu1 %v78_v3 }
   0xb   :  { %84 = vmatpush.bf16.msra.mxu0 %v143_v4  ;;  %145 = vmatpush.bf16.msra.mxu1 %v143_v4 }
   0xf   :  { %85 = vmatpush.bf16.msra.mxu0 %v142_v5  ;;  %146 = vmatpush.bf16.msra.mxu1 %v142_v5 }
  0x13   :  { %86 = vmatpush.bf16.msra.mxu0 %v141_v6  ;;  %147 = vmatpush.bf16.msra.mxu1 %v141_v6 }
  0x17   :  { %87 = vmatpush.bf16.msra.mxu0 %v140_v7  ;;  %148 = vmatpush.bf16.msra.mxu1 %v140_v7 }
  0x1a   :  { %136 = vmatmul.msk.bf16.vlgmr.msra.gmra.mxu0 %vm69_vm1, %v138_v8  ;;  %137 = vmatmul.msk.bf16.vlgmr.msra.gmra.mxu1 %vm69_vm1, %v139_v9 }
  0x97   :  { %v89_v11 = vpop.f32.mrf.mxu0  ;;  %v94_v12 = vpop.f32.mrf.mxu1 }
  0x98   :  { %v90_v13 = vadd.f32 %v149_v10, %v89_v11  ;;  %v95_v14 = vadd.f32 %v149_v10, %v94_v12 }
  0x9a   :  { %v99_v15 = vpack.c.bf16 %v90_v13, %v90_v13  ;;  %v101_v16 = vpack.c.bf16 %v95_v14, %v95_v14 }
  0x9c   :  { %104 = vst.msk [vmem:[%s209_s3] sm:$0xf] %vm103_vm2, %v99_v15 }
  0x9d   :  { %106 = vst.msk [vmem:[%s209_s3 + $0x8] sm:$0xf] %vm103_vm2, %v101_v16 }
  0x9f   :  { %v91_v17 = vpop.f32.mrf.mxu0  ;;  %v96_v18 = vpop.f32.mrf.mxu1 }
  0xa0   :  { %v92_v19 = vadd.f32 %v149_v10, %v91_v17  ;;  %v97_v20 = vadd.f32 %v149_v10, %v96_v18 }
  0xa2   :  { %v100_v21 = vpack.c.bf16 %v92_v19, %v92_v19  ;;  %v102_v22 = vpack.c.bf16 %v97_v20, %v97_v20 }
  0xa4   :  { %105 = vst.msk [vmem:[%s209_s3 + $0x4] sm:$0xf] %vm103_vm2, %v100_v21 }
  0xa5   :  { %107 = vst.msk [vmem:[%s209_s3 + $0xc] sm:$0xf] %vm103_vm2, %v102_v22 }

// kernel: _lambda_.8
= control target key start
LH: loop header
LB: loop body
LE: loop exit
PB: predicated region body
PF: predicated region fallthrough
CT: control target
= control target key end

     0   :  { %vm82_vm0 = vcmask 1043456   ;;  %vm75_vm1 = vcmask 588800   ;;  %vm123_vm2 = vcmask 1041408   ;;  %s230_s8 = smov 96   ;;  %vm116_vm3 = vcmask 31744   ;;  %s307_s1 = inlined_call_operand.vmem [shape: bf16[72,4], index: 1, kind: input, shape index: {}]   ;;  %s308_s2 = inlined_call_operand.vmem [shape: f32[1,4], index: 2, kind: input, shape index: {}]   ;;  %s309_s0 = inlined_call_operand.vmem [shape: bf16[32,72], index: 0, kind: input, shape index: {}]   ;;  %s310_s3 = inlined_call_operand.vmem [shape: bf16[4,8], index: 3, kind: input, shape index: {}]   ;;  %s311_s4 = inlined_call_operand.vmem [shape: f32[1,8], index: 4, kind: input, shape index: {}]   ;;  %s312_s5 = inlined_call_operand.vmem [shape: bf16[32,8], index: 5, kind: output, shape index: {}]  }
   0x1   :  { %v43_v0 = vld [vmem:[%s307_s1 + $0x20] sm:$0xf]  ;;  %v202_v4 = vld [vmem:[%s307_s1 + $0x18] sm:$0xff]  ;;  %v201_v5 = vld [vmem:[%s307_s1 + $0x10] sm:$0xff]  ;;  %vm170_vm4 = vcmask 60416  }
   0x2   :  { %v65_v1 = vunpack.c.l.b16 %v43_v0  ;;  %v204_v6 = vld [vmem:[%s309_s0] sm:$0xff]   ;;  %v211_v7 = vld [vmem:[%s309_s0 + $0x8] sm:$0xff]  }
   0x3   :  { %v205_v8 = vunpack.c.l.bf16 %v204_v6  ;;  %v206_v9 = vunpack.c.h.bf16 %v204_v6  ;;  %v209_v10 = vunpack.c.l.bf16 %v211_v7  ;;  %v210_v11 = vunpack.c.h.bf16 %v211_v7  ;;  %v200_v12 = vld [vmem:[%s307_s1 + $0x8] sm:$0xff]  ;;  %v199_v17 = vld [vmem:[%s307_s1] sm:$0xff] }
   0x4   :  { %v70_v2 = vpack.c.b16 %v65_v1, %v65_v1  ;;  %v111_v20 = vld [vmem:[%s310_s3] sm:$0x3] }
   0x5   :  { %v29_v13 = vmax.f32 %v205_v8, 0.0  ;;  %v30_v14 = vmax.f32 %v206_v9, 0.0  ;;  %v31_v15 = vmax.f32 %v209_v10, 0.0  ;;  %v32_v16 = vmax.f32 %v210_v11, 0.0  ;;  %v228_v25 = vld [vmem:[%s308_s2] ss:$0 sm:$0xff] }
   0x6   :  { %v84_v3 = vsel %vm82_vm0, %v70_v2, 0  ;;  %v125_v21 = vsel %vm123_vm2, %v111_v20, 0  ;;  %v218_v22 = vpack.i.bf16 %v206_v9, %v205_v8  ;;  %v223_v23 = vpack.i.bf16 %v210_v11, %v209_v10  ;;  %v229_v40 = vld [vmem:[%s311_s4] ss:$0 sm:$0xff] }
   0x7   :  { %89 = vmatpush.bf16.msra.mxu0 %v84_v3  ;;  %212 = vmatpush.bf16.msra.mxu2 %v84_v3  ;;  %v33_v18 = vpack.c.bf16 %v30_v14, %v29_v13  ;;  %v34_v19 = vpack.c.bf16 %v32_v16, %v31_v15 }
   0x8   :  { %134 = vmatpush.bf16.msra.mxu1 %v125_v21  ;;  %219 = vrot.lane.b32.xlu0 %v218_v22, %s230_s8 }
   0xb   :  { %90 = vmatpush.bf16.msra.mxu0 %v202_v4  ;;  %213 = vmatpush.bf16.msra.mxu2 %v202_v4 }
   0xf   :  { %91 = vmatpush.bf16.msra.mxu0 %v201_v5  ;;  %214 = vmatpush.bf16.msra.mxu2 %v201_v5 }
  0x10   :  { %224 = vrot.lane.b32.xlu0 %v223_v23, %s230_s8 }
  0x13   :  { %92 = vmatpush.bf16.msra.mxu0 %v200_v12  ;;  %215 = vmatpush.bf16.msra.mxu2 %v200_v12 }
  0x17   :  { %93 = vmatpush.bf16.msra.mxu0 %v199_v17  ;;  %216 = vmatpush.bf16.msra.mxu2 %v199_v17 }
  0x1a   :  { %195 = vmatmul.msk.bf16.vlgmr.msra.gmra.mxu0 %vm75_vm1, %v33_v18  ;;  %196 = vmatmul.msk.bf16.vlgmr.msra.gmra.mxu2 %vm75_vm1, %v34_v19 }
  0x7a   :  { %v220_v39 = vpop.permute.xlu0 %219 }
  0x7b   :  { %v221_v41 = vunpack.i.l.bf16 %v220_v39  ;;  %v222_v46 = vunpack.i.h.bf16 %v220_v39 }
  0x82   :  { %v225_v50 = vpop.permute.xlu0 %224 }
  0x83   :  { %v226_v52 = vunpack.i.l.bf16 %v225_v50  ;;  %v227_v57 = vunpack.i.h.bf16 %v225_v50 }
  0x97   :  { %v95_v24 = vpop.f32.mrf.mxu0 }
  0x98   :  { %v96_v26 = vadd.f32 %v228_v25, %v95_v24 }
  0x9a   :  { %v105_v30 = vmax.f32 %v96_v26, 0.0 }
  0x9d   :  { %v100_v28 = vpop.f32.mrf.mxu2 }
  0x9e   :  { %v101_v34 = vadd.f32 %v228_v25, %v100_v28 }
  0x9f   :  { %v97_v27 = vpop.f32.mrf.mxu0 }
  0xa0   :  { %v98_v29 = vadd.f32 %v228_v25, %v97_v27  ;;  %v107_v36 = vmax.f32 %v101_v34, 0.0 }
  0xa2   :  { %v106_v31 = vmax.f32 %v98_v29, 0.0 }
  0xa4   :  { %v109_v32 = vpack.c.bf16 %v106_v31, %v105_v30 }
  0xa5   :  { %v102_v33 = vpop.f32.mrf.mxu2 }
  0xa6   :  { %197 = vmatmul.msk.bf16.vlgmr.msra.gmra.mxu1 %vm116_vm3, %v109_v32  ;;  %v103_v35 = vadd.f32 %v228_v25, %v102_v33 }
  0xa8   :  { %v108_v37 = vmax.f32 %v103_v35, 0.0 }
  0xaa   :  { %v110_v38 = vpack.c.bf16 %v108_v37, %v107_v36 }
  0xb6   :  { %198 = vmatmul.msk.bf16.gmra.mxu1 %vm116_vm3, %v110_v38 }
 0x123   :  { %v136_v42 = vpop.f32.mrf.mxu1 }
 0x124   :  { %v137_v43 = vadd.f32 %v229_v40, %v136_v42 }
 0x126   :  { %v162_v44 = vadd.f32 %v221_v41, %v137_v43 }
 0x128   :  { %v166_v45 = vpack.c.bf16 %v162_v44, %v162_v44 }
 0x12a   :  { %171 = vst.msk [vmem:[%s312_s5] sm:$0xf] %vm170_vm4, %v166_v45 }
 0x12b   :  { %v138_v47 = vpop.f32.mrf.mxu1 }
 0x12c   :  { %v139_v48 = vadd.f32 %v229_v40, %v138_v47 }
 0x12e   :  { %v163_v49 = vadd.f32 %v222_v46, %v139_v48 }
 0x130   :  { %v167_v51 = vpack.c.bf16 %v163_v49, %v163_v49 }
 0x132   :  { %172 = vst.msk [vmem:[%s312_s5 + $0x4] sm:$0xf] %vm170_vm4, %v167_v51 }
 0x133   :  { %v141_v53 = vpop.f32.mrf.mxu1 }
 0x134   :  { %v142_v54 = vadd.f32 %v229_v40, %v141_v53 }
 0x136   :  { %v164_v55 = vadd.f32 %v226_v52, %v142_v54 }
 0x138   :  { %v168_v56 = vpack.c.bf16 %v164_v55, %v164_v55 }
 0x13a   :  { %173 = vst.msk [vmem:[%s312_s5 + $0x8] sm:$0xf] %vm170_vm4, %v168_v56 }
 0x13b   :  { %v143_v58 = vpop.f32.mrf.mxu1 }
 0x13c   :  { %v144_v59 = vadd.f32 %v229_v40, %v143_v58 }
 0x13e   :  { %v165_v60 = vadd.f32 %v227_v57, %v144_v59 }
 0x140   :  { %v169_v61 = vpack.c.bf16 %v165_v60, %v165_v60 }
 0x142   :  { %174 = vst.msk [vmem:[%s312_s5 + $0xc] sm:$0xf] %vm170_vm4, %v169_v61 }

// kernel: _lambda_.9
= control target key start
LH: loop header
LB: loop body
LE: loop exit
PB: predicated region body
PF: predicated region fallthrough
CT: control target
= control target key end

     0   :  { %vm82_vm0 = vcmask 1043456   ;;  %vm75_vm1 = vcmask 588800   ;;  %vm123_vm2 = vcmask 1041408   ;;  %s234_s8 = smov 96   ;;  %vm116_vm3 = vcmask 31744   ;;  %s311_s1 = inlined_call_operand.vmem [shape: bf16[72,4], index: 1, kind: input, shape index: {}]   ;;  %s312_s2 = inlined_call_operand.vmem [shape: f32[1,4], index: 2, kind: input, shape index: {}]   ;;  %s313_s0 = inlined_call_operand.vmem [shape: bf16[32,72], index: 0, kind: input, shape index: {}]   ;;  %s314_s3 = inlined_call_operand.vmem [shape: bf16[4,8], index: 3, kind: input, shape index: {}]   ;;  %s315_s4 = inlined_call_operand.vmem [shape: f32[1,8], index: 4, kind: input, shape index: {}]   ;;  %s316_s5 = inlined_call_operand.vmem [shape: bf16[32,8], index: 5, kind: output, shape index: {}]  }
   0x1   :  { %v43_v0 = vld [vmem:[%s311_s1 + $0x20] sm:$0xf]  ;;  %v206_v4 = vld [vmem:[%s311_s1 + $0x18] sm:$0xff]  ;;  %v205_v5 = vld [vmem:[%s311_s1 + $0x10] sm:$0xff]  ;;  %vm174_vm4 = vcmask 60416  }
   0x2   :  { %v65_v1 = vunpack.c.l.b16 %v43_v0  ;;  %v208_v6 = vld [vmem:[%s313_s0] sm:$0xff]   ;;  %v215_v7 = vld [vmem:[%s313_s0 + $0x8] sm:$0xff]  }
   0x3   :  { %v209_v8 = vunpack.c.l.bf16 %v208_v6  ;;  %v210_v9 = vunpack.c.h.bf16 %v208_v6  ;;  %v213_v10 = vunpack.c.l.bf16 %v215_v7  ;;  %v214_v11 = vunpack.c.h.bf16 %v215_v7  ;;  %v204_v12 = vld [vmem:[%s311_s1 + $0x8] sm:$0xff]  ;;  %v203_v17 = vld [vmem:[%s311_s1] sm:$0xff] }
   0x4   :  { %v70_v2 = vpack.c.b16 %v65_v1, %v65_v1  ;;  %v111_v20 = vld [vmem:[%s314_s3] sm:$0x3] }
   0x5   :  { %v29_v13 = vmax.f32 %v209_v8, 0.0  ;;  %v30_v14 = vmax.f32 %v210_v9, 0.0  ;;  %v31_v15 = vmax.f32 %v213_v10, 0.0  ;;  %v32_v16 = vmax.f32 %v214_v11, 0.0  ;;  %v232_v25 = vld [vmem:[%s312_s2] ss:$0 sm:$0xff] }
   0x6   :  { %v84_v3 = vsel %vm82_vm0, %v70_v2, 0  ;;  %v125_v21 = vsel %vm123_vm2, %v111_v20, 0  ;;  %v222_v22 = vpack.i.bf16 %v210_v9, %v209_v8  ;;  %v227_v23 = vpack.i.bf16 %v214_v11, %v213_v10  ;;  %v233_v40 = vld [vmem:[%s315_s4] ss:$0 sm:$0xff] }
   0x7   :  { %89 = vmatpush.bf16.msra.mxu0 %v84_v3  ;;  %216 = vmatpush.bf16.msra.mxu2 %v84_v3  ;;  %v33_v18 = vpack.c.bf16 %v30_v14, %v29_v13  ;;  %v34_v19 = vpack.c.bf16 %v32_v16, %v31_v15 }
   0x8   :  { %134 = vmatpush.bf16.msra.mxu1 %v125_v21  ;;  %223 = vrot.lane.b32.xlu0 %v222_v22, %s234_s8 }
   0xb   :  { %90 = vmatpush.bf16.msra.mxu0 %v206_v4  ;;  %217 = vmatpush.bf16.msra.mxu2 %v206_v4 }
   0xf   :  { %91 = vmatpush.bf16.msra.mxu0 %v205_v5  ;;  %218 = vmatpush.bf16.msra.mxu2 %v205_v5 }
  0x10   :  { %228 = vrot.lane.b32.xlu0 %v227_v23, %s234_s8 }
  0x13   :  { %92 = vmatpush.bf16.msra.mxu0 %v204_v12  ;;  %219 = vmatpush.bf16.msra.mxu2 %v204_v12 }
  0x17   :  { %93 = vmatpush.bf16.msra.mxu0 %v203_v17  ;;  %220 = vmatpush.bf16.msra.mxu2 %v203_v17 }
  0x1a   :  { %199 = vmatmul.msk.bf16.vlgmr.msra.gmra.mxu0 %vm75_vm1, %v33_v18  ;;  %200 = vmatmul.msk.bf16.vlgmr.msra.gmra.mxu2 %vm75_vm1, %v34_v19 }
  0x7a   :  { %v224_v39 = vpop.permute.xlu0 %223 }
  0x7b   :  { %v225_v41 = vunpack.i.l.bf16 %v224_v39  ;;  %v226_v46 = vunpack.i.h.bf16 %v224_v39 }
  0x82   :  { %v229_v51 = vpop.permute.xlu0 %228 }
  0x83   :  { %v230_v54 = vunpack.i.l.bf16 %v229_v51  ;;  %v231_v59 = vunpack.i.h.bf16 %v229_v51 }
  0x97   :  { %v95_v24 = vpop.f32.mrf.mxu0 }
  0x98   :  { %v96_v26 = vadd.f32 %v232_v25, %v95_v24 }
  0x9a   :  { %v105_v30 = vmax.f32 %v96_v26, 0.0 }
  0x9d   :  { %v100_v28 = vpop.f32.mrf.mxu2 }
  0x9e   :  { %v101_v34 = vadd.f32 %v232_v25, %v100_v28 }
  0x9f   :  { %v97_v27 = vpop.f32.mrf.mxu0 }
  0xa0   :  { %v98_v29 = vadd.f32 %v232_v25, %v97_v27  ;;  %v107_v36 = vmax.f32 %v101_v34, 0.0 }
  0xa2   :  { %v106_v31 = vmax.f32 %v98_v29, 0.0 }
  0xa4   :  { %v109_v32 = vpack.c.bf16 %v106_v31, %v105_v30 }
  0xa5   :  { %v102_v33 = vpop.f32.mrf.mxu2 }
  0xa6   :  { %201 = vmatmul.msk.bf16.vlgmr.msra.gmra.mxu1 %vm116_vm3, %v109_v32  ;;  %v103_v35 = vadd.f32 %v232_v25, %v102_v33 }
  0xa8   :  { %v108_v37 = vmax.f32 %v103_v35, 0.0 }
  0xaa   :  { %v110_v38 = vpack.c.bf16 %v108_v37, %v107_v36 }
  0xb6   :  { %202 = vmatmul.msk.bf16.gmra.mxu1 %vm116_vm3, %v110_v38 }
 0x123   :  { %v136_v42 = vpop.f32.mrf.mxu1 }
 0x124   :  { %v137_v43 = vadd.f32 %v233_v40, %v136_v42 }
 0x126   :  { %v162_v44 = vadd.f32 %v225_v41, %v137_v43 }
 0x128   :  { %v166_v45 = vmax.f32 %v162_v44, 0.0 }
 0x12a   :  { %v170_v47 = vpack.c.bf16 %v166_v45, %v166_v45 }
 0x12b   :  { %v138_v48 = vpop.f32.mrf.mxu1 }
 0x12c   :  { %175 = vst.msk [vmem:[%s316_s5] sm:$0xf] %vm174_vm4, %v170_v47  ;;  %v139_v49 = vadd.f32 %v233_v40, %v138_v48 }
 0x12e   :  { %v163_v50 = vadd.f32 %v226_v46, %v139_v49 }
 0x130   :  { %v167_v52 = vmax.f32 %v163_v50, 0.0 }
 0x132   :  { %v171_v53 = vpack.c.bf16 %v167_v52, %v167_v52 }
 0x133   :  { %v141_v55 = vpop.f32.mrf.mxu1 }
 0x134   :  { %176 = vst.msk [vmem:[%s316_s5 + $0x4] sm:$0xf] %vm174_vm4, %v171_v53  ;;  %v142_v56 = vadd.f32 %v233_v40, %v141_v55 }
 0x136   :  { %v164_v57 = vadd.f32 %v230_v54, %v142_v56 }
 0x138   :  { %v168_v58 = vmax.f32 %v164_v57, 0.0 }
 0x13a   :  { %v172_v60 = vpack.c.bf16 %v168_v58, %v168_v58 }
 0x13b   :  { %v143_v61 = vpop.f32.mrf.mxu1 }
 0x13c   :  { %177 = vst.msk [vmem:[%s316_s5 + $0x8] sm:$0xf] %vm174_vm4, %v172_v60  ;;  %v144_v62 = vadd.f32 %v233_v40, %v143_v61 }
 0x13e   :  { %v165_v63 = vadd.f32 %v231_v59, %v144_v62 }
 0x140   :  { %v169_v0 = vmax.f32 %v165_v63, 0.0 }
 0x142   :  { %v173_v1 = vpack.c.bf16 %v169_v0, %v169_v0 }
 0x144   :  { %178 = vst.msk [vmem:[%s316_s5 + $0xc] sm:$0xf] %vm174_vm4, %v173_v1 }

</bundles_post_ra>
